<compile_context>
chip_gen: v7x
topology: tpu7x:2x2x1
jax: 0.10.0
libtpu: 0.0.40
codegen_flags: <defaults>
</compile_context>

<pallas_src>
import math

import jax
import jax.numpy as jnp
from jax.experimental import pallas as pl
from jax.experimental.pallas import tpu as pltpu

H1 = 512          # hidden 1
H2 = 256          # hidden 2
OUT_LANES = 128   # lane-dense output slab width

# Resident-w1 path only when the estimated double-buffered VMEM footprint fits
# well under the smallest budget (v7x: 64 MiB physical per TensorCore).
_RESIDENT_VMEM_BUDGET = 40 * 1024 * 1024


def _round_up(x, m):
    return (x + m - 1) // m * m


# ---------------------------------------------------------------------------
# Kernel A: w1 fully VMEM-resident (no K streaming).  One layer-1 dot per
# batch tile, layers 2/3 fused, f32 accumulation, bf16 MXU inputs cast in-kernel.
# ---------------------------------------------------------------------------
def _disc_kernel_resident(x_ref, w1_ref, b1_ref, w2_ref, b2_ref, w3_ref, b3_ref,
                          o_ref):
    x = x_ref[...].astype(w1_ref.dtype)                 # f32 -> bf16 in VMEM (free under DMA/MXU)
    h1 = jnp.dot(x, w1_ref[...], preferred_element_type=jnp.float32) + b1_ref[...]
    h1 = jnp.where(h1 > 0, h1, 0.2 * h1)                # LeakyReLU(0.2), f32 on VPU

    h2 = jnp.dot(h1.astype(w2_ref.dtype), w2_ref[...],  # bf16 MXU, f32 accum
                 preferred_element_type=jnp.float32) + b2_ref[...]
    h2 = jnp.where(h2 > 0, h2, 0.2 * h2)

    # Final Linear(256, 1): VPU multiply + XLU lane reduction (no N=1 matmul).
    val = jnp.sum(h2 * w3_ref[...], axis=-1, keepdims=True) + b3_ref[0, 0]  # (tile_b, 1)

    # Lane-dense store: broadcast across 128 lanes; wrapper slices column 0.
    o_ref[...] = jnp.broadcast_to(val, o_ref.shape).astype(o_ref.dtype)


# ---------------------------------------------------------------------------
# Kernel B: K-streamed layer 1 (fallback for very large D where w1 cannot be
# resident).  f32 accumulator scratch with pl.when init/finalize.
# ---------------------------------------------------------------------------
def _disc_kernel_stream(x_ref, w1_ref, b1_ref, w2_ref, b2_ref, w3_ref, b3_ref,
                        o_ref, acc_ref):
    k = pl.program_id(1)

    @pl.when(k == 0)
    def _init():
        acc_ref[...] = jnp.zeros_like(acc_ref)

    acc_ref[...] += jnp.dot(x_ref[...].astype(w1_ref.dtype), w1_ref[...],
                            preferred_element_type=jnp.float32)

    @pl.when(k == pl.num_programs(1) - 1)
    def _finalize():
        h1 = acc_ref[...] + b1_ref[...]
        h1 = jnp.where(h1 > 0, h1, 0.2 * h1)

        h2 = jnp.dot(h1.astype(w2_ref.dtype), w2_ref[...],
                     preferred_element_type=jnp.float32) + b2_ref[...]
        h2 = jnp.where(h2 > 0, h2, 0.2 * h2)

        val = jnp.sum(h2 * w3_ref[...], axis=-1, keepdims=True) + b3_ref[0, 0]
        o_ref[...] = jnp.broadcast_to(val, o_ref.shape).astype(o_ref.dtype)


def discriminator_forward(img, params, *, tile_b=None, tile_k=None,
                          force_stream=False):
    """img: (B, C, H, W) float32, NCHW (same convention as the PyTorch module)."""
    B = img.shape[0]
    x = img.reshape(B, -1)                    # (B, D) f32; bf16 cast happens in-kernel
    w1, b1, w2, b2, w3, b3 = params
    D = x.shape[1]
    assert w1.shape[0] == D, "w1 fan_in must match flattened image size"

    # ---- batch tiling: fill the MXU (~256 rows) but keep >=2 tiles when B
    # allows so the 'parallel' axis shards across both v7x TensorCores. ----
    if tile_b is None:
        if B > 256:
            nb_target = pl.cdiv(B, 256)
        elif B >= 64:
            nb_target = 2
        else:
            nb_target = 1
        tile_b = _round_up(pl.cdiv(B, nb_target), 8)
    B_pad = _round_up(B, tile_b)
    if B_pad != B:
        x = jnp.pad(x, ((0, B_pad - B), (0, 0)))
    nb = B_pad // tile_b

    # ---- reduction-dim padding (zero pads contribute 0 to the dot) ----
    D_pad = _round_up(D, 128)

    # Estimated double-buffered VMEM footprint of the resident-w1 variant.
    resident_vmem = (2 * tile_b * D_pad * 4          # x tiles, f32
                     + 2 * D_pad * H1 * 2            # w1, bf16
                     + 2 * H1 * H2 * 2               # w2, bf16
                     + 2 * tile_b * OUT_LANES * 4    # out tiles
                     + 4 * tile_b * H1 * 4)          # intermediates headroom
    use_resident = (not force_stream) and resident_vmem <= _RESIDENT_VMEM_BUDGET

    if D_pad != D:
        x = jnp.pad(x, ((0, 0), (0, D_pad - D)))
        w1 = jnp.pad(w1, ((0, D_pad - D), (0, 0)))

    flops = 2 * B * (D * H1 + H1 * H2 + H2)
    small_bytes = (b1.size + b2.size + w3.size + b3.size) * 4

    if use_resident:
        bytes_accessed = (B_pad * D_pad * 4 + D_pad * H1 * 2 + H1 * H2 * 2
                          + small_bytes + B_pad * OUT_LANES * 4)
        vmem_limit = int(min(max(resident_vmem + (8 << 20), 32 << 20), 56 << 20))
        out = pl.pallas_call(
            _disc_kernel_resident,
            out_shape=jax.ShapeDtypeStruct((B_pad, OUT_LANES), jnp.float32),
            grid_spec=pltpu.PrefetchScalarGridSpec(
                num_scalar_prefetch=0,
                grid=(nb,),
                in_specs=[
                    pl.BlockSpec((tile_b, D_pad), lambda i: (i, 0)),   # x tile (f32)
                    pl.BlockSpec((D_pad, H1),    lambda i: (0, 0)),    # w1 resident (bf16)
                    pl.BlockSpec((1, H1),        lambda i: (0, 0)),    # b1
                    pl.BlockSpec((H1, H2),       lambda i: (0, 0)),    # w2 resident (bf16)
                    pl.BlockSpec((1, H2),        lambda i: (0, 0)),    # b2
                    pl.BlockSpec((1, H2),        lambda i: (0, 0)),    # w3 row (f32)
                    pl.BlockSpec(memory_space=pltpu.MemorySpace.SMEM), # b3 scalar
                ],
                out_specs=pl.BlockSpec((tile_b, OUT_LANES), lambda i: (i, 0)),
            ),
            compiler_params=pltpu.CompilerParams(
                dimension_semantics=("parallel",),
                vmem_limit_bytes=vmem_limit,
            ),
            cost_estimate=pl.CostEstimate(
                flops=int(flops), transcendentals=0,
                bytes_accessed=int(bytes_accessed)),
        )(x, w1, b1, w2, b2, w3, b3)
    else:
        # K-streamed layer 1.  Pick tile_k dividing D_pad (D_pad is a multiple of
        # 128) so no additional padding copy of x is required.
        if tile_k is None:
            tile_k = min(2048, D_pad)
            while D_pad % tile_k:
                tile_k -= 128
        assert tile_k % 128 == 0 and D_pad % tile_k == 0
        nk = D_pad // tile_k

        stream_vmem = (2 * tile_b * tile_k * 4 + 2 * tile_k * H1 * 2
                       + 2 * H1 * H2 * 2 + 2 * tile_b * OUT_LANES * 4
                       + tile_b * H1 * 4            # accumulator scratch
                       + 4 * tile_b * H1 * 4)       # intermediates headroom
        vmem_limit = int(min(max(stream_vmem + (8 << 20), 32 << 20), 56 << 20))
        bytes_accessed = (B_pad * D_pad * 4 + nb * D_pad * H1 * 2 + H1 * H2 * 2
                          + small_bytes + B_pad * OUT_LANES * 4)
        out = pl.pallas_call(
            _disc_kernel_stream,
            out_shape=jax.ShapeDtypeStruct((B_pad, OUT_LANES), jnp.float32),
            grid_spec=pltpu.PrefetchScalarGridSpec(
                num_scalar_prefetch=0,
                grid=(nb, nk),
                in_specs=[
                    pl.BlockSpec((tile_b, tile_k), lambda i, k: (i, k)),  # x tile (f32)
                    pl.BlockSpec((tile_k, H1),    lambda i, k: (k, 0)),   # w1 K-slice (bf16)
                    pl.BlockSpec((1, H1),         lambda i, k: (0, 0)),   # b1
                    pl.BlockSpec((H1, H2),        lambda i, k: (0, 0)),   # w2 (bf16)
                    pl.BlockSpec((1, H2),         lambda i, k: (0, 0)),   # b2
                    pl.BlockSpec((1, H2),         lambda i, k: (0, 0)),   # w3 row (f32)
                    pl.BlockSpec(memory_space=pltpu.MemorySpace.SMEM),    # b3 scalar
                ],
                out_specs=pl.BlockSpec((tile_b, OUT_LANES), lambda i, k: (i, 0)),
                scratch_shapes=[pltpu.VMEM((tile_b, H1), jnp.float32)],   # layer-1 accumulator
            ),
            compiler_params=pltpu.CompilerParams(
                dimension_semantics=("parallel", "arbitrary"),
                vmem_limit_bytes=vmem_limit,
            ),
            cost_estimate=pl.CostEstimate(
                flops=int(flops), transcendentals=0,
                bytes_accessed=int(bytes_accessed)),
        )(x, w1, b1, w2, b2, w3, b3)

    return out[:B, :1]


def init_params(key, in_features):
    """Mimics nn.Linear default init (U(-1/sqrt(fan_in), +1/sqrt(fan_in))).
    Big-layer weights stored as bf16 (in, out); last layer stored as a (1, 256)
    f32 row for the VPU reduction; biases f32."""
    dims = [(in_features, H1), (H1, H2), (H2, 1)]
    params = []
    for li, (fan_in, fan_out) in enumerate(dims):
        key, kw, kb = jax.random.split(key, 3)
        bound = 1.0 / math.sqrt(fan_in)
        w = jax.random.uniform(kw, (fan_in, fan_out), jnp.float32, -bound, bound)
        b = jax.random.uniform(kb, (1, fan_out), jnp.float32, -bound, bound)
        if li < 2:
            params += [w.astype(jnp.bfloat16), b]
        else:
            params += [w.T, b]        # (1, 256) f32 row, (1, 1) f32 bias
    return tuple(params)


def reference_forward(img, params):
    """Pure-JAX reference using the same bf16 operand / f32 accumulation scheme."""
    x = img.reshape(img.shape[0], -1).astype(jnp.bfloat16)
    w1, b1, w2, b2, w3, b3 = params
    h = jnp.dot(x, w1, preferred_element_type=jnp.float32) + b1
    h = jnp.where(h > 0, h, 0.2 * h)
    h = jnp.dot(h.astype(jnp.bfloat16), w2, preferred_element_type=jnp.float32) + b2
    h = jnp.where(h > 0, h, 0.2 * h)
    return jnp.sum(h * w3, axis=-1, keepdims=True) + b3


if __name__ == "__main__":
    # Small shapes consistent with the module: channels=3, img_size=16 -> D = 768.
    B, C, Hh, Ww = 8, 3, 16, 16
    key = jax.random.PRNGKey(0)
    k_img, k_par = jax.random.split(key)

    img = jax.random.normal(k_img, (B, C, Hh, Ww), jnp.float32)
    params = init_params(k_par, C * Hh * Ww)

    ref = reference_forward(img, params)

    # Resident-w1 fast path (default for this D).
    out = jax.block_until_ready(discriminator_forward(img, params))
    assert out.shape == (B, 1)
    max_err = float(jnp.max(jnp.abs(out - ref)))
    assert jnp.allclose(out, ref, atol=1e-3, rtol=1e-3), \
        f"resident path mismatch vs reference (max err {max_err})"

    # K-streamed fallback (used for very large D); exercised here with tile_k=256.
    out_s = jax.block_until_ready(
        discriminator_forward(img, params, force_stream=True, tile_k=256))
    assert out_s.shape == (B, 1)
    max_err_s = float(jnp.max(jnp.abs(out_s - ref)))
    assert jnp.allclose(out_s, ref, atol=1e-3, rtol=1e-3), \
        f"stream path mismatch vs reference (max err {max_err_s})"

    print("KERNEL_OK")
</pallas_src>

<mosaic_0001>
module attributes {stable_mosaic.version = 11 : i64} {
  func.func @_disc_kernel_resident(%arg0: i32, %arg1: memref<8x768xf32, #tpu.memory_space<vmem>>, %arg2: memref<768x512xbf16, #tpu.memory_space<vmem>>, %arg3: memref<1x512xf32, #tpu.memory_space<vmem>>, %arg4: memref<512x256xbf16, #tpu.memory_space<vmem>>, %arg5: memref<1x256xf32, #tpu.memory_space<vmem>>, %arg6: memref<1x256xf32, #tpu.memory_space<vmem>>, %arg7: memref<1x1xf32, #tpu.memory_space<smem>>, %arg8: memref<8x128xf32, #tpu.memory_space<vmem>>) attributes {dimension_semantics = [#tpu.dimension_semantics<parallel>], iteration_bounds = array<i64: 1>, scalar_prefetch = 0 : i64, scratch_operands = 0 : i64, tpu.core_type = #tpu.core_type<tc>, window_params = [{transform_indices = @transform_0, window_bounds = array<i64: 8, 768>}, {pipeline_mode = #tpu.pipeline_mode<synchronous>, transform_indices = @transform_1, window_bounds = array<i64: 768, 512>}, {pipeline_mode = #tpu.pipeline_mode<synchronous>, transform_indices = @transform_2, window_bounds = array<i64: 1, 512>}, {pipeline_mode = #tpu.pipeline_mode<synchronous>, transform_indices = @transform_3, window_bounds = array<i64: 512, 256>}, {pipeline_mode = #tpu.pipeline_mode<synchronous>, transform_indices = @transform_4, window_bounds = array<i64: 1, 256>}, {pipeline_mode = #tpu.pipeline_mode<synchronous>, transform_indices = @transform_5, window_bounds = array<i64: 1, 256>}, {transform_indices = @transform_6, window_bounds = array<i64: 1, 1>}, {transform_indices = @transform_7, window_bounds = array<i64: 8, 128>}]} {
    %c0 = arith.constant 0 : index
    %c0_0 = arith.constant 0 : index
    %0 = vector.load %arg1[%c0, %c0_0] : memref<8x768xf32, #tpu.memory_space<vmem>>, vector<8x768xf32>
    %1 = arith.truncf %0 : vector<8x768xf32> to vector<8x768xbf16>
    %c0_1 = arith.constant 0 : index
    %c0_2 = arith.constant 0 : index
    %2 = vector.load %arg2[%c0_1, %c0_2] : memref<768x512xbf16, #tpu.memory_space<vmem>>, vector<768x512xbf16>
    %cst = arith.constant dense<0.000000e+00> : vector<8x512xf32>
    %3 = tpu.matmul %1, %2, %cst {dimension_numbers = #tpu.dot_dimension_numbers<[1], [0], [0], [1], [0, 0, 1, 1], [], []>} : vector<8x768xbf16>, vector<768x512xbf16>, vector<8x512xf32> -> vector<8x512xf32>
    %c0_3 = arith.constant 0 : index
    %c0_4 = arith.constant 0 : index
    %4 = vector.load %arg3[%c0_3, %c0_4] : memref<1x512xf32, #tpu.memory_space<vmem>>, vector<1x512xf32>
    %5 = vector.broadcast %4 : vector<1x512xf32> to vector<8x512xf32>
    %6 = arith.addf %3, %5 : vector<8x512xf32>
    %cst_5 = arith.constant 0.000000e+00 : f32
    %7 = vector.broadcast %cst_5 : f32 to vector<8x512xf32>
    %8 = arith.cmpf ogt, %6, %7 : vector<8x512xf32>
    %cst_6 = arith.constant 2.000000e-01 : f32
    %9 = vector.broadcast %cst_6 : f32 to vector<8x512xf32>
    %10 = arith.mulf %9, %6 : vector<8x512xf32>
    %11 = arith.select %8, %6, %10 : vector<8x512xi1>, vector<8x512xf32>
    %12 = arith.truncf %11 : vector<8x512xf32> to vector<8x512xbf16>
    %c0_7 = arith.constant 0 : index
    %c0_8 = arith.constant 0 : index
    %13 = vector.load %arg4[%c0_7, %c0_8] : memref<512x256xbf16, #tpu.memory_space<vmem>>, vector<512x256xbf16>
    %cst_9 = arith.constant dense<0.000000e+00> : vector<8x256xf32>
    %14 = tpu.matmul %12, %13, %cst_9 {dimension_numbers = #tpu.dot_dimension_numbers<[1], [0], [0], [1], [0, 0, 1, 1], [], []>} : vector<8x512xbf16>, vector<512x256xbf16>, vector<8x256xf32> -> vector<8x256xf32>
    %c0_10 = arith.constant 0 : index
    %c0_11 = arith.constant 0 : index
    %15 = vector.load %arg5[%c0_10, %c0_11] : memref<1x256xf32, #tpu.memory_space<vmem>>, vector<1x256xf32>
    %16 = vector.broadcast %15 : vector<1x256xf32> to vector<8x256xf32>
    %17 = arith.addf %14, %16 : vector<8x256xf32>
    %cst_12 = arith.constant 0.000000e+00 : f32
    %18 = vector.broadcast %cst_12 : f32 to vector<8x256xf32>
    %19 = arith.cmpf ogt, %17, %18 : vector<8x256xf32>
    %cst_13 = arith.constant 2.000000e-01 : f32
    %20 = vector.broadcast %cst_13 : f32 to vector<8x256xf32>
    %21 = arith.mulf %20, %17 : vector<8x256xf32>
    %22 = arith.select %19, %17, %21 : vector<8x256xi1>, vector<8x256xf32>
    %c0_14 = arith.constant 0 : index
    %c0_15 = arith.constant 0 : index
    %23 = vector.load %arg6[%c0_14, %c0_15] : memref<1x256xf32, #tpu.memory_space<vmem>>, vector<1x256xf32>
    %24 = vector.broadcast %23 : vector<1x256xf32> to vector<8x256xf32>
    %25 = arith.mulf %22, %24 : vector<8x256xf32>
    %cst_16 = arith.constant dense<0.000000e+00> : vector<8xf32>
    %26 = vector.multi_reduction <add>, %25, %cst_16 [1] : vector<8x256xf32> to vector<8xf32>
    %27 = vector.shape_cast %26 : vector<8xf32> to vector<8x1xf32>
    %c0_17 = arith.constant 0 : index
    %c0_18 = arith.constant 0 : index
    %28 = memref.load %arg7[%c0_17, %c0_18] : memref<1x1xf32, #tpu.memory_space<smem>>
    %29 = vector.broadcast %28 : f32 to vector<8x1xf32>
    %30 = arith.addf %27, %29 : vector<8x1xf32>
    %31 = vector.shape_cast %30 : vector<8x1xf32> to vector<8x1xf32>
    %32 = vector.broadcast %31 : vector<8x1xf32> to vector<8x128xf32>
    %c0_19 = arith.constant 0 : index
    %c0_20 = arith.constant 0 : index
    %33 = vector.load %arg8[%c0_19, %c0_20] : memref<8x128xf32, #tpu.memory_space<vmem>>, vector<8x128xf32>
    tpu.vector_store %arg8[%c0_19, %c0_20], %32 {strides = array<i32>} : memref<8x128xf32, #tpu.memory_space<vmem>>, vector<8x128xf32>,
    return
  }
  func.func @transform_0(%arg0: i32) -> (i32, i32) {
    %c0_i32 = arith.constant 0 : i32
    %c0_i32_0 = arith.constant 0 : i32
    return %arg0, %c0_i32 : i32, i32
  }
  func.func @transform_1(%arg0: i32) -> (i32, i32) {
    %c0_i32 = arith.constant 0 : i32
    %c0_i32_0 = arith.constant 0 : i32
    %c0_i32_1 = arith.constant 0 : i32
    return %c0_i32, %c0_i32_0 : i32, i32
  }
  func.func @transform_2(%arg0: i32) -> (i32, i32) {
    %c0_i32 = arith.constant 0 : i32
    %c0_i32_0 = arith.constant 0 : i32
    %c0_i32_1 = arith.constant 0 : i32
    return %c0_i32, %c0_i32_0 : i32, i32
  }
  func.func @transform_3(%arg0: i32) -> (i32, i32) {
    %c0_i32 = arith.constant 0 : i32
    %c0_i32_0 = arith.constant 0 : i32
    %c0_i32_1 = arith.constant 0 : i32
    return %c0_i32, %c0_i32_0 : i32, i32
  }
  func.func @transform_4(%arg0: i32) -> (i32, i32) {
    %c0_i32 = arith.constant 0 : i32
    %c0_i32_0 = arith.constant 0 : i32
    %c0_i32_1 = arith.constant 0 : i32
    return %c0_i32, %c0_i32_0 : i32, i32
  }
  func.func @transform_5(%arg0: i32) -> (i32, i32) {
    %c0_i32 = arith.constant 0 : i32
    %c0_i32_0 = arith.constant 0 : i32
    %c0_i32_1 = arith.constant 0 : i32
    return %c0_i32, %c0_i32_0 : i32, i32
  }
  func.func @transform_6(%arg0: i32) -> (i32, i32) {
    %c0_i32 = arith.constant 0 : i32
    %c0_i32_0 = arith.constant 0 : i32
    %c0_i32_1 = arith.constant 0 : i32
    return %c0_i32, %c0_i32_0 : i32, i32
  }
  func.func @transform_7(%arg0: i32) -> (i32, i32) {
    %c0_i32 = arith.constant 0 : i32
    %c0_i32_0 = arith.constant 0 : i32
    return %arg0, %c0_i32 : i32, i32
  }
}

</mosaic_0001>

<bundles_post_ra>
// kernel: tpu_custom_call.1
= control target key start
LH: loop header
LB: loop body
LE: loop exit
PB: predicated region body
PF: predicated region fallthrough
CT: control target
= control target key end

     0   :  { %13 = vsyncpa [#allocation4], 0  ;;  %s2956_s0 = inlined_call_operand.hbm [shape: f32[8,768], index: 0, kind: input, shape index: {}]   ;;  %s2957_s1 = inlined_call_operand.hbm [shape: bf16[768,512], index: 1, kind: input, shape index: {}]   ;;  %s2958_s2 = inlined_call_operand.vmem [shape: f32[1,512], index: 2, kind: input, shape index: {}]   ;;  %s2959_s3 = inlined_call_operand.hbm [shape: bf16[512,256], index: 3, kind: input, shape index: {}]   ;;  %s2960_s4 = inlined_call_operand.vmem [shape: f32[1,256], index: 4, kind: input, shape index: {}]   ;;  %s2961_s5 = inlined_call_operand.vmem [shape: f32[1,256], index: 5, kind: input, shape index: {}]   ;;  %s2962_s6 = inlined_call_operand.<no memory space> [shape: f32[1,1], index: 6, kind: input, shape index: {}]   ;;  %s2963_s7 = inlined_call_operand.hbm [shape: f32[8,128], index: 7, kind: output, shape index: {}]  }
   0x1   :  { %14 = vsyncpa [#allocation7], 0 }
   0x2   :  { %15 = vsyncpa [#allocation5], 0  ;;  %s2802_s24 = smov [#allocation6]   ;;  %s2708_s28 = scalar_lea.hbm %s2957_s1, 24576 }
   0x3   :  { %s31_s25 = sshll.u32 %s2802_s24, 4  ;;  %p2709_p0 = scmp.ne.s32.totalorder %s2957_s1, %s2708_s28  ;;  %s32_s25 = int_to_ptr.vmem [resolvable:$true] %s31_s25 }
   0x4   :  { %p2712_p1 = scmp.lt.u32.totalorder %s2708_s28, %s2957_s1 }
   0x6   :  { %p2714_p2 = pnand %p2712_p1, %p2709_p0 }
   0x8   :  { %2717 = shalt.err (!%p2714_p2)
}
   0x9   :  { %s2718_s10 = scalar_lea.vmem %s32_s25, 24576  ;;  %p2723_p4 = scmp.lt.s32.totalorder %s32_s25, %s32_s25 }
   0xa   :  { %p2719_p3 = scmp.ne.s32.totalorder %s32_s25, %s2718_s10  ;;  %p2724_p5 = scmp.lt.s32.totalorder %s2718_s10, %s2718_s10 }
   0xc   :  { %p2725_p6 = por %p2724_p5, %p2723_p4 }
   0xe   :  { %p2726_p7 = pnand %p2725_p6, %p2719_p3 }
  0x10   :  { %2729 = shalt.err (!%p2726_p7)
}
  0x11   :  { %s2803_s11 = smov 256   ;;  %s2804_s12 = smov 16  }
  0x12   :  { %37 = dma.hbm_to_vmem [thread:$0]  %s2957_s1, 24576, %s32_s25, [#allocation7], %s2803_s11, %s2803_s11, %s2804_s12  }
  0x13   :  { %s2805_s15 = smov [#allocation3]   ;;  %s2806_s17 = smov [#allocation8]  }
  0x14   :  { %s22_s16 = sshll.u32 %s2805_s15, 4  ;;  %s45_s18 = sshll.u32 %s2806_s17, 4  ;;  %s23_s16 = int_to_ptr.vmem [resolvable:$true] %s22_s16  ;;  %s46_s18 = int_to_ptr.vmem [resolvable:$true] %s45_s18 }
  0x15   :  { %s2730_s21 = scalar_lea.hbm %s2956_s0, 768 }
  0x16   :  { %p2731_p8 = scmp.ne.s32.totalorder %s2956_s0, %s2730_s21  ;;  %p2734_p9 = scmp.lt.u32.totalorder %s2730_s21, %s2956_s0 }
  0x18   :  { %p2736_p10 = pnand %p2734_p9, %p2731_p8 }
  0x1a   :  { %2739 = shalt.err (!%p2736_p10)
}
  0x1b   :  { %s2740_s1 = scalar_lea.vmem %s23_s16, 768  ;;  %p2745_p12 = scmp.lt.s32.totalorder %s23_s16, %s23_s16 }
  0x1c   :  { %p2741_p11 = scmp.ne.s32.totalorder %s23_s16, %s2740_s1  ;;  %p2746_p13 = scmp.lt.s32.totalorder %s2740_s1, %s2740_s1 }
  0x1e   :  { %p2747_p0 = por %p2746_p13, %p2745_p12 }
  0x20   :  { %p2748_p1 = pnand %p2747_p0, %p2741_p11 }
  0x22   :  { %2751 = shalt.err (!%p2748_p1)
}
  0x23   :  { %25 = dma.hbm_to_vmem [thread:$0]  %s2956_s0, 768, %s23_s16, [#allocation4]  }
  0x24   :  { %s2752_s30 = scalar_lea.hbm %s2959_s3, 8192 }
  0x25   :  { %p2753_p2 = scmp.ne.s32.totalorder %s2959_s3, %s2752_s30  ;;  %p2756_p3 = scmp.lt.u32.totalorder %s2752_s30, %s2959_s3 }
  0x27   :  { %p2758_p4 = pnand %p2756_p3, %p2753_p2 }
  0x29   :  { %2761 = shalt.err (!%p2758_p4)
}
  0x2a   :  { %s2762_s12 = scalar_lea.vmem %s46_s18, 8192  ;;  %p2767_p6 = scmp.lt.s32.totalorder %s46_s18, %s46_s18 }
  0x2b   :  { %p2763_p5 = scmp.ne.s32.totalorder %s46_s18, %s2762_s12  ;;  %p2768_p7 = scmp.lt.s32.totalorder %s2762_s12, %s2762_s12 }
  0x2d   :  { %p2769_p8 = por %p2768_p7, %p2767_p6 }
  0x2f   :  { %p2770_p9 = pnand %p2769_p8, %p2763_p5 }
  0x31   :  { %2773 = shalt.err (!%p2770_p9)
}
  0x32   :  { %s2807_s0 = smov 128   ;;  %s2808_s13 = smov 8  }
  0x33   :  { %51 = dma.hbm_to_vmem [thread:$0]  %s2959_s3, 8192, %s46_s18, [#allocation7], %s2807_s0, %s2807_s0, %s2808_s13  }
  0x34   :  { %2796 = dma.done.wait [#allocation4], 768  }
  0x35   :  { %2797 = vsyncadd [#allocation4], 4294966528 }
  0x36   :  { %2798 = dma.done.wait [#allocation7], 32768  }
  0x37   :  { %2799 = vsyncadd [#allocation7], 4294934528  ;;  %v2324_v0 = vld [vmem:[#allocation6 + $0x4] ss:$16 sps:$4 sm:$0xff]   ;;  %v2328_v2 = vld [vmem:[#allocation6] ss:$16 sps:$4 sm:$0xff]  }
  0x38   :  { %v2326_v1 = vld [vmem:[#allocation6 + $0x204] ss:$16 sps:$4 sm:$0xff]   ;;  %1253 = vmatprep.subr.bf16.mxu1 %v2324_v0  ;;  %v2329_v3 = vld [vmem:[#allocation6 + $0x200] ss:$16 sps:$4 sm:$0xff]   ;;  %v68_v46 = vld [vmem:[#allocation3 + $0x8] sm:$0xff]  ;;  %s2809_s20 = smov [#allocation9]  }
  0x39   :  { %1294 = vmatprep.subr.bf16.mxu0 %v2326_v1  ;;  %v2330_v4 = vld [vmem:[#allocation6 + $0x24] ss:$16 sps:$4 sm:$0xff]   ;;  %1254 = vmatpush1.bf16.msra.mxu1 %v2328_v2  ;;  %v2334_v6 = vld [vmem:[#allocation6 + $0x20] ss:$16 sps:$4 sm:$0xff]   ;;  %v2886_v48 = vpack.c.bf16 %v68_v46, %v68_v46  ;;  %v70_v49 = vld [vmem:[#allocation3 + $0x18] sm:$0xff]  ;;  %s2026_s21 = sshll.u32 %s2809_s20, 4  ;;  %s2027_s21 = int_to_ptr.vmem [resolvable:$true] %s2026_s21 }
  0x3a   :  { %1295 = vmatpush1.bf16.msra.mxu0 %v2329_v3  ;;  %v2332_v5 = vld [vmem:[#allocation6 + $0x224] ss:$16 sps:$4 sm:$0xff]   ;;  %1255 = vmatprep.subr.bf16.mxu1 %v2330_v4  ;;  %v2335_v7 = vld [vmem:[#allocation6 + $0x220] ss:$16 sps:$4 sm:$0xff]   ;;  %v2888_v52 = vpack.c.bf16 %v70_v49, %v70_v49  ;;  %v2477_v49 = vld [vmem:[#allocation6 + $0x128] ss:$16 sps:$4 sm:$0xff]   ;;  %p2779_p11 = scmp.lt.s32.totalorder %s2027_s21, %s2027_s21 }
  0x3b   :  { %1296 = vmatprep.subr.bf16.mxu0 %v2332_v5  ;;  %v2336_v8 = vld [vmem:[#allocation6 + $0x44] ss:$16 sps:$4 sm:$0xff]   ;;  %v2340_v10 = vld [vmem:[#allocation6 + $0x40] ss:$16 sps:$4 sm:$0xff]   ;;  %1285 = vmatprep.mubr.bf16.mxu1 %v2886_v48  ;;  %s2774_s22 = scalar_lea.vmem %s2027_s21, 128 }
  0x3c   :  { %v2338_v9 = vld [vmem:[#allocation6 + $0x244] ss:$16 sps:$4 sm:$0xff]   ;;  %v2341_v11 = vld [vmem:[#allocation6 + $0x240] ss:$16 sps:$4 sm:$0xff]   ;;  %1326 = vmatprep.mubr.bf16.mxu0 %v2888_v52  ;;  %p2775_p10 = scmp.ne.s32.totalorder %s2027_s21, %s2774_s22  ;;  %p2780_p12 = scmp.lt.s32.totalorder %s2774_s22, %s2774_s22 }
  0x3d   :  { %1256 = vmatpush1.bf16.msra.mxu1 %v2334_v6  ;;  %v2342_v12 = vld [vmem:[#allocation6 + $0x64] ss:$16 sps:$4 sm:$0xff]   ;;  %v2346_v14 = vld [vmem:[#allocation6 + $0x60] ss:$16 sps:$4 sm:$0xff]  }
  0x3e   :  { %1297 = vmatpush1.bf16.msra.mxu0 %v2335_v7  ;;  %1257 = vmatprep.subr.bf16.mxu1 %v2336_v8  ;;  %v2344_v13 = vld [vmem:[#allocation6 + $0x264] ss:$16 sps:$4 sm:$0xff]   ;;  %v2347_v15 = vld [vmem:[#allocation6 + $0x260] ss:$16 sps:$4 sm:$0xff]   ;;  %v2425_v7 = vld [vmem:[#allocation6 + $0xc] ss:$16 sps:$4 sm:$0xff]   ;;  %p2781_p13 = por %p2780_p12, %p2779_p11 }
  0x3f   :  { %1298 = vmatprep.subr.bf16.mxu0 %v2338_v9  ;;  %v2348_v16 = vld [vmem:[#allocation6 + $0x84] ss:$16 sps:$4 sm:$0xff]   ;;  %v2352_v18 = vld [vmem:[#allocation6 + $0x80] ss:$16 sps:$4 sm:$0xff]  }
  0x40   :  { %v2350_v17 = vld [vmem:[#allocation6 + $0x284] ss:$16 sps:$4 sm:$0xff]   ;;  %v2353_v19 = vld [vmem:[#allocation6 + $0x280] ss:$16 sps:$4 sm:$0xff]   ;;  %p2782_p0 = pnand %p2781_p13, %p2775_p10 }
  0x41   :  { %1258 = vmatpush1.bf16.msra.mxu1 %v2340_v10  ;;  %v2354_v20 = vld [vmem:[#allocation6 + $0xa4] ss:$16 sps:$4 sm:$0xff]   ;;  %v2358_v22 = vld [vmem:[#allocation6 + $0xa0] ss:$16 sps:$4 sm:$0xff]   ;;  %v2423_v10 = vld [vmem:[#allocation6 + $0x8] ss:$16 sps:$4 sm:$0xff]  }
  0x42   :  { %1299 = vmatpush1.bf16.msra.mxu0 %v2341_v11  ;;  %1259 = vmatprep.subr.bf16.mxu1 %v2342_v12  ;;  %v2356_v21 = vld [vmem:[#allocation6 + $0x2a4] ss:$16 sps:$4 sm:$0xff]   ;;  %v2359_v23 = vld [vmem:[#allocation6 + $0x2a0] ss:$16 sps:$4 sm:$0xff]  }
  0x43   :  { %1300 = vmatprep.subr.bf16.mxu0 %v2344_v13  ;;  %v2360_v24 = vld [vmem:[#allocation6 + $0xc4] ss:$16 sps:$4 sm:$0xff]   ;;  %v2364_v26 = vld [vmem:[#allocation6 + $0xc0] ss:$16 sps:$4 sm:$0xff]   ;;  %v2431_v13 = vld [vmem:[#allocation6 + $0x2c] ss:$16 sps:$4 sm:$0xff]  }
  0x44   :  { %v2362_v25 = vld [vmem:[#allocation6 + $0x2c4] ss:$16 sps:$4 sm:$0xff]   ;;  %v2365_v27 = vld [vmem:[#allocation6 + $0x2c0] ss:$16 sps:$4 sm:$0xff]  }
  0x45   :  { %1260 = vmatpush1.bf16.msra.mxu1 %v2346_v14  ;;  %v2366_v28 = vld [vmem:[#allocation6 + $0xe4] ss:$16 sps:$4 sm:$0xff]   ;;  %v2370_v30 = vld [vmem:[#allocation6 + $0xe0] ss:$16 sps:$4 sm:$0xff]  }
  0x46   :  { %1301 = vmatpush1.bf16.msra.mxu0 %v2347_v15  ;;  %1261 = vmatprep.subr.bf16.mxu1 %v2348_v16  ;;  %v2368_v29 = vld [vmem:[#allocation6 + $0x2e4] ss:$16 sps:$4 sm:$0xff]   ;;  %v2371_v31 = vld [vmem:[#allocation6 + $0x2e0] ss:$16 sps:$4 sm:$0xff]   ;;  %v2429_v15 = vld [vmem:[#allocation6 + $0x28] ss:$16 sps:$4 sm:$0xff]  }
  0x47   :  { %1302 = vmatprep.subr.bf16.mxu0 %v2350_v17  ;;  %v2372_v32 = vld [vmem:[#allocation6 + $0x104] ss:$16 sps:$4 sm:$0xff]   ;;  %v2376_v34 = vld [vmem:[#allocation6 + $0x100] ss:$16 sps:$4 sm:$0xff]   ;;  %v2437_v17 = vld [vmem:[#allocation6 + $0x4c] ss:$16 sps:$4 sm:$0xff]  }
  0x48   :  { %v2374_v33 = vld [vmem:[#allocation6 + $0x304] ss:$16 sps:$4 sm:$0xff]   ;;  %v2377_v35 = vld [vmem:[#allocation6 + $0x300] ss:$16 sps:$4 sm:$0xff]  }
  0x49   :  { %1262 = vmatpush1.bf16.msra.mxu1 %v2352_v18  ;;  %v2378_v36 = vld [vmem:[#allocation6 + $0x124] ss:$16 sps:$4 sm:$0xff]   ;;  %v2382_v38 = vld [vmem:[#allocation6 + $0x120] ss:$16 sps:$4 sm:$0xff]  }
  0x4a   :  { %1303 = vmatpush1.bf16.msra.mxu0 %v2353_v19  ;;  %1263 = vmatprep.subr.bf16.mxu1 %v2354_v20  ;;  %v2380_v37 = vld [vmem:[#allocation6 + $0x324] ss:$16 sps:$4 sm:$0xff]   ;;  %v2383_v39 = vld [vmem:[#allocation6 + $0x320] ss:$16 sps:$4 sm:$0xff]   ;;  %v2435_v19 = vld [vmem:[#allocation6 + $0x48] ss:$16 sps:$4 sm:$0xff]  }
  0x4b   :  { %1304 = vmatprep.subr.bf16.mxu0 %v2356_v21  ;;  %v2384_v40 = vld [vmem:[#allocation6 + $0x144] ss:$16 sps:$4 sm:$0xff]   ;;  %v2388_v42 = vld [vmem:[#allocation6 + $0x140] ss:$16 sps:$4 sm:$0xff]   ;;  %v2443_v21 = vld [vmem:[#allocation6 + $0x6c] ss:$16 sps:$4 sm:$0xff]  }
  0x4c   :  { %v2386_v41 = vld [vmem:[#allocation6 + $0x344] ss:$16 sps:$4 sm:$0xff]   ;;  %v2389_v43 = vld [vmem:[#allocation6 + $0x340] ss:$16 sps:$4 sm:$0xff]  }
  0x4d   :  { %1264 = vmatpush1.bf16.msra.mxu1 %v2358_v22  ;;  %v2390_v44 = vld [vmem:[#allocation6 + $0x164] ss:$16 sps:$4 sm:$0xff]   ;;  %v2394_v47 = vld [vmem:[#allocation6 + $0x160] ss:$16 sps:$4 sm:$0xff]  }
  0x4e   :  { %1305 = vmatpush1.bf16.msra.mxu0 %v2359_v23  ;;  %1265 = vmatprep.subr.bf16.mxu1 %v2360_v24  ;;  %v2392_v45 = vld [vmem:[#allocation6 + $0x364] ss:$16 sps:$4 sm:$0xff]   ;;  %v2395_v50 = vld [vmem:[#allocation6 + $0x360] ss:$16 sps:$4 sm:$0xff]   ;;  %v2441_v23 = vld [vmem:[#allocation6 + $0x68] ss:$16 sps:$4 sm:$0xff]  }
  0x4f   :  { %1306 = vmatprep.subr.bf16.mxu0 %v2362_v25  ;;  %v2396_v51 = vld [vmem:[#allocation6 + $0x184] ss:$16 sps:$4 sm:$0xff]   ;;  %v2400_v54 = vld [vmem:[#allocation6 + $0x180] ss:$16 sps:$4 sm:$0xff]   ;;  %v2449_v25 = vld [vmem:[#allocation6 + $0x8c] ss:$16 sps:$4 sm:$0xff]  }
  0x50   :  { %v2398_v53 = vld [vmem:[#allocation6 + $0x384] ss:$16 sps:$4 sm:$0xff]   ;;  %v2401_v55 = vld [vmem:[#allocation6 + $0x380] ss:$16 sps:$4 sm:$0xff]  }
  0x51   :  { %1266 = vmatpush1.bf16.msra.mxu1 %v2364_v26  ;;  %v2402_v56 = vld [vmem:[#allocation6 + $0x1a4] ss:$16 sps:$4 sm:$0xff]   ;;  %v2406_v58 = vld [vmem:[#allocation6 + $0x1a0] ss:$16 sps:$4 sm:$0xff]  }
  0x52   :  { %1307 = vmatpush1.bf16.msra.mxu0 %v2365_v27  ;;  %1267 = vmatprep.subr.bf16.mxu1 %v2366_v28  ;;  %v2404_v57 = vld [vmem:[#allocation6 + $0x3a4] ss:$16 sps:$4 sm:$0xff]   ;;  %v2407_v59 = vld [vmem:[#allocation6 + $0x3a0] ss:$16 sps:$4 sm:$0xff]   ;;  %v2447_v27 = vld [vmem:[#allocation6 + $0x88] ss:$16 sps:$4 sm:$0xff]  }
  0x53   :  { %1308 = vmatprep.subr.bf16.mxu0 %v2368_v29  ;;  %v2408_v60 = vld [vmem:[#allocation6 + $0x1c4] ss:$16 sps:$4 sm:$0xff]   ;;  %v2412_v62 = vld [vmem:[#allocation6 + $0x1c0] ss:$16 sps:$4 sm:$0xff]   ;;  %v2455_v29 = vld [vmem:[#allocation6 + $0xac] ss:$16 sps:$4 sm:$0xff]  }
  0x54   :  { %v2410_v61 = vld [vmem:[#allocation6 + $0x3c4] ss:$16 sps:$4 sm:$0xff]   ;;  %v2413_v63 = vld [vmem:[#allocation6 + $0x3c0] ss:$16 sps:$4 sm:$0xff]  }
  0x55   :  { %1268 = vmatpush1.bf16.msra.mxu1 %v2370_v30  ;;  %v2414_v0 = vld [vmem:[#allocation6 + $0x1e4] ss:$16 sps:$4 sm:$0xff]   ;;  %v2418_v2 = vld [vmem:[#allocation6 + $0x1e0] ss:$16 sps:$4 sm:$0xff]  }
  0x56   :  { %1309 = vmatpush1.bf16.msra.mxu0 %v2371_v31  ;;  %1269 = vmatprep.subr.bf16.mxu1 %v2372_v32  ;;  %v2416_v1 = vld [vmem:[#allocation6 + $0x3e4] ss:$16 sps:$4 sm:$0xff]   ;;  %v2419_v3 = vld [vmem:[#allocation6 + $0x3e0] ss:$16 sps:$4 sm:$0xff]   ;;  %v2453_v31 = vld [vmem:[#allocation6 + $0xa8] ss:$16 sps:$4 sm:$0xff]  }
  0x57   :  { %1310 = vmatprep.subr.bf16.mxu0 %v2374_v33  ;;  %v67_v4 = vld [vmem:[#allocation3] sm:$0xff]  ;;  %v69_v6 = vld [vmem:[#allocation3 + $0x10] sm:$0xff]  ;;  %v2461_v33 = vld [vmem:[#allocation6 + $0xcc] ss:$16 sps:$4 sm:$0xff]  }
  0x58   :  { %v2422_v5 = vld [vmem:[#allocation6 + $0x404] ss:$16 sps:$4 sm:$0xff]   ;;  %v2892_v8 = vpack.c.bf16 %v67_v4, %v67_v4  ;;  %v2420_v9 = vld [vmem:[#allocation6 + $0x400] ss:$16 sps:$4 sm:$0xff]   ;;  %v2894_v11 = vpack.c.bf16 %v69_v6, %v69_v6  ;;  %v2509_v4 = vld [vmem:[#allocation6 + $0x1cc] ss:$16 sps:$4 sm:$0xff]  }
  0x59   :  { %1270 = vmatpush1.bf16.msra.mxu1 %v2376_v34  ;;  %v2428_v12 = vld [vmem:[#allocation6 + $0x424] ss:$16 sps:$4 sm:$0xff]   ;;  %v2426_v14 = vld [vmem:[#allocation6 + $0x420] ss:$16 sps:$4 sm:$0xff]   ;;  %v72_v34 = vld [vmem:[#allocation3 + $0x28] sm:$0xff] }
  0x5a   :  { %1311 = vmatpush1.bf16.msra.mxu0 %v2377_v35  ;;  %1271 = vmatprep.subr.bf16.mxu1 %v2378_v36  ;;  %v2434_v16 = vld [vmem:[#allocation6 + $0x444] ss:$16 sps:$4 sm:$0xff]   ;;  %v2432_v18 = vld [vmem:[#allocation6 + $0x440] ss:$16 sps:$4 sm:$0xff]   ;;  %v2899_v35 = vpack.c.bf16 %v72_v34, %v72_v34  ;;  %v2507_v6 = vld [vmem:[#allocation6 + $0x1c8] ss:$16 sps:$4 sm:$0xff]  }
  0x5b   :  { %1312 = vmatprep.subr.bf16.mxu0 %v2380_v37  ;;  %v2440_v20 = vld [vmem:[#allocation6 + $0x464] ss:$16 sps:$4 sm:$0xff]   ;;  %v2438_v22 = vld [vmem:[#allocation6 + $0x460] ss:$16 sps:$4 sm:$0xff]   ;;  %v2459_v37 = vld [vmem:[#allocation6 + $0xc8] ss:$16 sps:$4 sm:$0xff]  }
  0x5c   :  { %v2446_v24 = vld [vmem:[#allocation6 + $0x484] ss:$16 sps:$4 sm:$0xff]   ;;  %v2444_v26 = vld [vmem:[#allocation6 + $0x480] ss:$16 sps:$4 sm:$0xff]  }
  0x5d   :  { %1272 = vmatpush1.bf16.msra.mxu1 %v2382_v38  ;;  %v2452_v28 = vld [vmem:[#allocation6 + $0x4a4] ss:$16 sps:$4 sm:$0xff]   ;;  %v2450_v30 = vld [vmem:[#allocation6 + $0x4a0] ss:$16 sps:$4 sm:$0xff]  }
  0x5e   :  { %1313 = vmatpush1.bf16.msra.mxu0 %v2383_v39  ;;  %1273 = vmatprep.subr.bf16.mxu1 %v2384_v40  ;;  %v2458_v32 = vld [vmem:[#allocation6 + $0x4c4] ss:$16 sps:$4 sm:$0xff]   ;;  %v2456_v36 = vld [vmem:[#allocation6 + $0x4c0] ss:$16 sps:$4 sm:$0xff]   ;;  %v2467_v39 = vld [vmem:[#allocation6 + $0xec] ss:$16 sps:$4 sm:$0xff]  }
  0x5f   :  { %1314 = vmatprep.subr.bf16.mxu0 %v2386_v41  ;;  %v2464_v38 = vld [vmem:[#allocation6 + $0x4e4] ss:$16 sps:$4 sm:$0xff]   ;;  %v2462_v40 = vld [vmem:[#allocation6 + $0x4e0] ss:$16 sps:$4 sm:$0xff]   ;;  %v2465_v41 = vld [vmem:[#allocation6 + $0xe8] ss:$16 sps:$4 sm:$0xff]  }
  0x60   :  { %v2476_v46 = vld [vmem:[#allocation6 + $0x524] ss:$16 sps:$4 sm:$0xff]  }
  0x61   :  { %1274 = vmatpush1.bf16.msra.mxu1 %v2388_v42  ;;  %v2470_v42 = vld [vmem:[#allocation6 + $0x504] ss:$16 sps:$4 sm:$0xff]  }
  0x62   :  { %1315 = vmatpush1.bf16.msra.mxu0 %v2389_v43  ;;  %1275 = vmatprep.subr.bf16.mxu1 %v2390_v44  ;;  %v2473_v43 = vld [vmem:[#allocation6 + $0x10c] ss:$16 sps:$4 sm:$0xff]   ;;  %v2468_v44 = vld [vmem:[#allocation6 + $0x500] ss:$16 sps:$4 sm:$0xff]  }
  0x63   :  { %1316 = vmatprep.subr.bf16.mxu0 %v2392_v45  ;;  %v2471_v45 = vld [vmem:[#allocation6 + $0x108] ss:$16 sps:$4 sm:$0xff]   ;;  %v2620_v34 = vld [vmem:[#allocation8 + $0x24] ss:$8 sps:$4 sm:$0xff]  }
  0x65   :  { %1276 = vmatpush1.bf16.msra.mxu1 %v2394_v47  ;;  %v2479_v47 = vld [vmem:[#allocation6 + $0x12c] ss:$16 sps:$4 sm:$0xff]  }
  0x66   :  { %1317 = vmatpush1.bf16.msra.mxu0 %v2395_v50  ;;  %1277 = vmatprep.subr.bf16.mxu1 %v2396_v51  ;;  %v2482_v50 = vld [vmem:[#allocation6 + $0x544] ss:$16 sps:$4 sm:$0xff]   ;;  %v2485_v51 = vld [vmem:[#allocation6 + $0x14c] ss:$16 sps:$4 sm:$0xff]  }
  0x67   :  { %1318 = vmatprep.subr.bf16.mxu0 %v2398_v53  ;;  %v2480_v53 = vld [vmem:[#allocation6 + $0x540] ss:$16 sps:$4 sm:$0xff]  }
  0x69   :  { %1278 = vmatpush1.bf16.msra.mxu1 %v2400_v54  ;;  %v2483_v54 = vld [vmem:[#allocation6 + $0x148] ss:$16 sps:$4 sm:$0xff]  }
  0x6a   :  { %1319 = vmatpush1.bf16.msra.mxu0 %v2401_v55  ;;  %1279 = vmatprep.subr.bf16.mxu1 %v2402_v56  ;;  %v2488_v55 = vld [vmem:[#allocation6 + $0x564] ss:$16 sps:$4 sm:$0xff]   ;;  %v2491_v56 = vld [vmem:[#allocation6 + $0x16c] ss:$16 sps:$4 sm:$0xff]  }
  0x6b   :  { %1320 = vmatprep.subr.bf16.mxu0 %v2404_v57  ;;  %v2486_v57 = vld [vmem:[#allocation6 + $0x560] ss:$16 sps:$4 sm:$0xff]  }
  0x6d   :  { %1280 = vmatpush1.bf16.msra.mxu1 %v2406_v58  ;;  %v2489_v58 = vld [vmem:[#allocation6 + $0x168] ss:$16 sps:$4 sm:$0xff]  }
  0x6e   :  { %1321 = vmatpush1.bf16.msra.mxu0 %v2407_v59  ;;  %1281 = vmatprep.subr.bf16.mxu1 %v2408_v60  ;;  %v2494_v59 = vld [vmem:[#allocation6 + $0x584] ss:$16 sps:$4 sm:$0xff]   ;;  %v2497_v60 = vld [vmem:[#allocation6 + $0x18c] ss:$16 sps:$4 sm:$0xff]  }
  0x6f   :  { %1322 = vmatprep.subr.bf16.mxu0 %v2410_v61  ;;  %v2492_v61 = vld [vmem:[#allocation6 + $0x580] ss:$16 sps:$4 sm:$0xff]  }
  0x71   :  { %1282 = vmatpush1.bf16.msra.mxu1 %v2412_v62  ;;  %v2495_v62 = vld [vmem:[#allocation6 + $0x188] ss:$16 sps:$4 sm:$0xff]  }
  0x72   :  { %1323 = vmatpush1.bf16.msra.mxu0 %v2413_v63  ;;  %1283 = vmatprep.subr.bf16.mxu1 %v2414_v0  ;;  %v2500_v63 = vld [vmem:[#allocation6 + $0x5a4] ss:$16 sps:$4 sm:$0xff]   ;;  %v2503_v0 = vld [vmem:[#allocation6 + $0x1ac] ss:$16 sps:$4 sm:$0xff]  }
  0x73   :  { %1324 = vmatprep.subr.bf16.mxu0 %v2416_v1  ;;  %v2498_v1 = vld [vmem:[#allocation6 + $0x5a0] ss:$16 sps:$4 sm:$0xff]  }
  0x75   :  { %1284 = vmatpush1.bf16.msra.mxu1 %v2418_v2  ;;  %v2501_v2 = vld [vmem:[#allocation6 + $0x1a8] ss:$16 sps:$4 sm:$0xff]  }
  0x76   :  { %1325 = vmatpush1.bf16.msra.mxu0 %v2419_v3  ;;  %1376 = vmatprep.subr.bf16.mxu1 %v2425_v7  ;;  %v2506_v3 = vld [vmem:[#allocation6 + $0x5c4] ss:$16 sps:$4 sm:$0xff]  }
  0x77   :  { %1335 = vmatprep.subr.bf16.mxu0 %v2422_v5  ;;  %v2504_v5 = vld [vmem:[#allocation6 + $0x5c0] ss:$16 sps:$4 sm:$0xff]   ;;  %v2512_v7 = vld [vmem:[#allocation6 + $0x5e4] ss:$16 sps:$4 sm:$0xff]  }
  0x78   :  { %1286 = vmatmul.mubr.bf16.vlgmr.msra.gmra.mrb[0].mxu1 %v2892_v8 }
  0x79   :  { %1327 = vmatmul.mubr.bf16.vlgmr.msra.gmra.mrb[0].mxu0 %v2894_v11  ;;  %1377 = vmatpush1.bf16.msra.mxu1 %v2423_v10  ;;  %v2510_v10 = vld [vmem:[#allocation6 + $0x5e0] ss:$16 sps:$4 sm:$0xff]  }
  0x7a   :  { %1336 = vmatpush1.bf16.msra.mxu0 %v2420_v9  ;;  %1378 = vmatprep.subr.bf16.mxu1 %v2431_v13  ;;  %v2515_v9 = vld [vmem:[#allocation6 + $0x1ec] ss:$16 sps:$4 sm:$0xff]   ;;  %v71_v13 = vld [vmem:[#allocation3 + $0x20] sm:$0xff] }
  0x7b   :  { %1337 = vmatprep.subr.bf16.mxu0 %v2428_v12  ;;  %1408 = vmatprep.mubr.bf16.mxu1 %v2886_v48  ;;  %v2474_v48 = vld [vmem:[#allocation6 + $0x520] ss:$16 sps:$4 sm:$0xff]   ;;  %v2513_v12 = vld [vmem:[#allocation6 + $0x1e8] ss:$16 sps:$4 sm:$0xff]  }
  0x7c   :  { %1367 = vmatprep.mubr.bf16.mxu0 %v2899_v35 }
  0x7d   :  { %1379 = vmatpush1.bf16.msra.mxu1 %v2429_v15  ;;  %v2902_v15 = vpack.c.bf16 %v71_v13, %v71_v13  ;;  %v2645_v13 = vld [vmem:[#allocation8 + $0xb0] ss:$8 sps:$4 sm:$0xff]  }
  0x7e   :  { %1338 = vmatpush1.bf16.msra.mxu0 %v2426_v14  ;;  %1380 = vmatprep.subr.bf16.mxu1 %v2437_v17  ;;  %v2518_v14 = vld [vmem:[#allocation6 + $0x20c] ss:$16 sps:$4 sm:$0xff]  }
  0x7f   :  { %1339 = vmatprep.subr.bf16.mxu0 %v2434_v16  ;;  %v2516_v16 = vld [vmem:[#allocation6 + $0x208] ss:$16 sps:$4 sm:$0xff]   ;;  %v2521_v17 = vld [vmem:[#allocation6 + $0x22c] ss:$16 sps:$4 sm:$0xff]  }
  0x81   :  { %1381 = vmatpush1.bf16.msra.mxu1 %v2435_v19  ;;  %v2524_v19 = vld [vmem:[#allocation6 + $0x24c] ss:$16 sps:$4 sm:$0xff]  }
  0x82   :  { %1340 = vmatpush1.bf16.msra.mxu0 %v2432_v18  ;;  %1382 = vmatprep.subr.bf16.mxu1 %v2443_v21  ;;  %v2519_v18 = vld [vmem:[#allocation6 + $0x228] ss:$16 sps:$4 sm:$0xff]   ;;  %v2527_v21 = vld [vmem:[#allocation6 + $0x26c] ss:$16 sps:$4 sm:$0xff]  }
  0x83   :  { %1341 = vmatprep.subr.bf16.mxu0 %v2440_v20  ;;  %v2522_v20 = vld [vmem:[#allocation6 + $0x248] ss:$16 sps:$4 sm:$0xff]  }
  0x85   :  { %1383 = vmatpush1.bf16.msra.mxu1 %v2441_v23  ;;  %v2530_v23 = vld [vmem:[#allocation6 + $0x28c] ss:$16 sps:$4 sm:$0xff]  }
  0x86   :  { %1342 = vmatpush1.bf16.msra.mxu0 %v2438_v22  ;;  %1384 = vmatprep.subr.bf16.mxu1 %v2449_v25  ;;  %v2525_v22 = vld [vmem:[#allocation6 + $0x268] ss:$16 sps:$4 sm:$0xff]   ;;  %v2533_v25 = vld [vmem:[#allocation6 + $0x2ac] ss:$16 sps:$4 sm:$0xff]  }
  0x87   :  { %1343 = vmatprep.subr.bf16.mxu0 %v2446_v24  ;;  %v2528_v24 = vld [vmem:[#allocation6 + $0x288] ss:$16 sps:$4 sm:$0xff]  }
  0x89   :  { %1385 = vmatpush1.bf16.msra.mxu1 %v2447_v27  ;;  %v2536_v27 = vld [vmem:[#allocation6 + $0x2cc] ss:$16 sps:$4 sm:$0xff]  }
  0x8a   :  { %1344 = vmatpush1.bf16.msra.mxu0 %v2444_v26  ;;  %1386 = vmatprep.subr.bf16.mxu1 %v2455_v29  ;;  %v2531_v26 = vld [vmem:[#allocation6 + $0x2a8] ss:$16 sps:$4 sm:$0xff]   ;;  %v2614_v29 = vld [vmem:[#allocation8 + $0x4] ss:$8 sps:$4 sm:$0xff]  }
  0x8b   :  { %1345 = vmatprep.subr.bf16.mxu0 %v2452_v28  ;;  %v2612_v28 = vld [vmem:[#allocation8] ss:$8 sps:$4 sm:$0xff]  }
  0x8d   :  { %1387 = vmatpush1.bf16.msra.mxu1 %v2453_v31  ;;  %v2537_v31 = vld [vmem:[#allocation6 + $0x2e8] ss:$16 sps:$4 sm:$0xff]  }
  0x8e   :  { %1346 = vmatpush1.bf16.msra.mxu0 %v2450_v30  ;;  %1388 = vmatprep.subr.bf16.mxu1 %v2461_v33  ;;  %v2617_v30 = vld [vmem:[#allocation8 + $0x14] ss:$8 sps:$4 sm:$0xff]  }
  0x8f   :  { %1347 = vmatprep.subr.bf16.mxu0 %v2458_v32  ;;  %v2615_v32 = vld [vmem:[#allocation8 + $0x10] ss:$8 sps:$4 sm:$0xff]   ;;  %v2542_v33 = vld [vmem:[#allocation6 + $0x30c] ss:$16 sps:$4 sm:$0xff]  }
  0x91   :  { %1389 = vmatpush1.bf16.msra.mxu1 %v2459_v37  ;;  %v2618_v37 = vld [vmem:[#allocation8 + $0x20] ss:$8 sps:$4 sm:$0xff]  }
  0x92   :  { %1348 = vmatpush1.bf16.msra.mxu0 %v2456_v36  ;;  %1390 = vmatprep.subr.bf16.mxu1 %v2467_v39  ;;  %v2540_v36 = vld [vmem:[#allocation6 + $0x308] ss:$16 sps:$4 sm:$0xff]   ;;  %v2623_v39 = vld [vmem:[#allocation8 + $0x34] ss:$8 sps:$4 sm:$0xff]  }
  0x93   :  { %1349 = vmatprep.subr.bf16.mxu0 %v2464_v38  ;;  %v2545_v38 = vld [vmem:[#allocation6 + $0x32c] ss:$16 sps:$4 sm:$0xff]  }
  0x95   :  { %1391 = vmatpush1.bf16.msra.mxu1 %v2465_v41  ;;  %v2621_v41 = vld [vmem:[#allocation8 + $0x30] ss:$8 sps:$4 sm:$0xff]  }
  0x96   :  { %1350 = vmatpush1.bf16.msra.mxu0 %v2462_v40  ;;  %1392 = vmatprep.subr.bf16.mxu1 %v2473_v43  ;;  %v2543_v40 = vld [vmem:[#allocation6 + $0x328] ss:$16 sps:$4 sm:$0xff]   ;;  %v2626_v43 = vld [vmem:[#allocation8 + $0x44] ss:$8 sps:$4 sm:$0xff]  }
  0x97   :  { %1351 = vmatprep.subr.bf16.mxu0 %v2470_v42  ;;  %v2548_v42 = vld [vmem:[#allocation6 + $0x34c] ss:$16 sps:$4 sm:$0xff]  }
  0x99   :  { %1393 = vmatpush1.bf16.msra.mxu1 %v2471_v45  ;;  %v2624_v45 = vld [vmem:[#allocation8 + $0x40] ss:$8 sps:$4 sm:$0xff]  }
  0x9a   :  { %1352 = vmatpush1.bf16.msra.mxu0 %v2468_v44  ;;  %1394 = vmatprep.subr.bf16.mxu1 %v2479_v47  ;;  %v2546_v44 = vld [vmem:[#allocation6 + $0x348] ss:$16 sps:$4 sm:$0xff]   ;;  %v2629_v47 = vld [vmem:[#allocation8 + $0x54] ss:$8 sps:$4 sm:$0xff]  }
  0x9b   :  { %1353 = vmatprep.subr.bf16.mxu0 %v2476_v46  ;;  %v2551_v46 = vld [vmem:[#allocation6 + $0x36c] ss:$16 sps:$4 sm:$0xff]  }
  0x9d   :  { %1395 = vmatpush1.bf16.msra.mxu1 %v2477_v49  ;;  %v2627_v49 = vld [vmem:[#allocation8 + $0x50] ss:$8 sps:$4 sm:$0xff]  }
  0x9e   :  { %1354 = vmatpush1.bf16.msra.mxu0 %v2474_v48  ;;  %1396 = vmatprep.subr.bf16.mxu1 %v2485_v51  ;;  %v2549_v48 = vld [vmem:[#allocation6 + $0x368] ss:$16 sps:$4 sm:$0xff]   ;;  %v2632_v51 = vld [vmem:[#allocation8 + $0x64] ss:$8 sps:$4 sm:$0xff]  }
  0x9f   :  { %1355 = vmatprep.subr.bf16.mxu0 %v2482_v50  ;;  %v2554_v50 = vld [vmem:[#allocation6 + $0x38c] ss:$16 sps:$4 sm:$0xff]  }
  0xa1   :  { %1397 = vmatpush1.bf16.msra.mxu1 %v2483_v54  ;;  %v2630_v54 = vld [vmem:[#allocation8 + $0x60] ss:$8 sps:$4 sm:$0xff]  }
  0xa2   :  { %1356 = vmatpush1.bf16.msra.mxu0 %v2480_v53  ;;  %1398 = vmatprep.subr.bf16.mxu1 %v2491_v56  ;;  %v2552_v53 = vld [vmem:[#allocation6 + $0x388] ss:$16 sps:$4 sm:$0xff]   ;;  %v2635_v56 = vld [vmem:[#allocation8 + $0x74] ss:$8 sps:$4 sm:$0xff]  }
  0xa3   :  { %1357 = vmatprep.subr.bf16.mxu0 %v2488_v55  ;;  %v2557_v55 = vld [vmem:[#allocation6 + $0x3ac] ss:$16 sps:$4 sm:$0xff]  }
  0xa5   :  { %1399 = vmatpush1.bf16.msra.mxu1 %v2489_v58  ;;  %v2633_v58 = vld [vmem:[#allocation8 + $0x70] ss:$8 sps:$4 sm:$0xff]  }
  0xa6   :  { %1358 = vmatpush1.bf16.msra.mxu0 %v2486_v57  ;;  %1400 = vmatprep.subr.bf16.mxu1 %v2497_v60  ;;  %v2555_v57 = vld [vmem:[#allocation6 + $0x3a8] ss:$16 sps:$4 sm:$0xff]   ;;  %v2638_v60 = vld [vmem:[#allocation8 + $0x84] ss:$8 sps:$4 sm:$0xff]  }
  0xa7   :  { %1359 = vmatprep.subr.bf16.mxu0 %v2494_v59  ;;  %v2560_v59 = vld [vmem:[#allocation6 + $0x3cc] ss:$16 sps:$4 sm:$0xff]  }
  0xa9   :  { %1401 = vmatpush1.bf16.msra.mxu1 %v2495_v62  ;;  %v2636_v62 = vld [vmem:[#allocation8 + $0x80] ss:$8 sps:$4 sm:$0xff]  }
  0xaa   :  { %1360 = vmatpush1.bf16.msra.mxu0 %v2492_v61  ;;  %1402 = vmatprep.subr.bf16.mxu1 %v2503_v0  ;;  %v2558_v61 = vld [vmem:[#allocation6 + $0x3c8] ss:$16 sps:$4 sm:$0xff]   ;;  %v2641_v0 = vld [vmem:[#allocation8 + $0x94] ss:$8 sps:$4 sm:$0xff]  }
  0xab   :  { %1361 = vmatprep.subr.bf16.mxu0 %v2500_v63  ;;  %v2563_v63 = vld [vmem:[#allocation6 + $0x3ec] ss:$16 sps:$4 sm:$0xff]  }
  0xad   :  { %1403 = vmatpush1.bf16.msra.mxu1 %v2501_v2  ;;  %v2639_v2 = vld [vmem:[#allocation8 + $0x90] ss:$8 sps:$4 sm:$0xff]  }
  0xae   :  { %1362 = vmatpush1.bf16.msra.mxu0 %v2498_v1  ;;  %1404 = vmatprep.subr.bf16.mxu1 %v2509_v4  ;;  %v2561_v1 = vld [vmem:[#allocation6 + $0x3e8] ss:$16 sps:$4 sm:$0xff]   ;;  %v2644_v4 = vld [vmem:[#allocation8 + $0xa4] ss:$8 sps:$4 sm:$0xff]  }
  0xaf   :  { %1363 = vmatprep.subr.bf16.mxu0 %v2506_v3  ;;  %v2566_v3 = vld [vmem:[#allocation6 + $0x40c] ss:$16 sps:$4 sm:$0xff]  }
  0xb1   :  { %1405 = vmatpush1.bf16.msra.mxu1 %v2507_v6  ;;  %v2569_v6 = vld [vmem:[#allocation6 + $0x42c] ss:$16 sps:$4 sm:$0xff]  }
  0xb2   :  { %1364 = vmatpush1.bf16.msra.mxu0 %v2504_v5  ;;  %1406 = vmatprep.subr.bf16.mxu1 %v2515_v9  ;;  %v2564_v5 = vld [vmem:[#allocation6 + $0x408] ss:$16 sps:$4 sm:$0xff]   ;;  %v2647_v9 = vld [vmem:[#allocation8 + $0xb4] ss:$8 sps:$4 sm:$0xff]  }
  0xb3   :  { %1365 = vmatprep.subr.bf16.mxu0 %v2512_v7  ;;  %v2642_v7 = vld [vmem:[#allocation8 + $0xa0] ss:$8 sps:$4 sm:$0xff]  }
  0xb5   :  { %1407 = vmatpush1.bf16.msra.mxu1 %v2513_v12  ;;  %v2572_v12 = vld [vmem:[#allocation6 + $0x44c] ss:$16 sps:$4 sm:$0xff]  }
  0xb6   :  { %1366 = vmatpush1.bf16.msra.mxu0 %v2510_v10  ;;  %1417 = vmatprep.subr.bf16.mxu1 %v2518_v14  ;;  %v2567_v10 = vld [vmem:[#allocation6 + $0x428] ss:$16 sps:$4 sm:$0xff]   ;;  %v2650_v14 = vld [vmem:[#allocation8 + $0xc4] ss:$8 sps:$4 sm:$0xff]  }
  0xb7   :  { %1911 = vmatprep.subr.bf16.mxu0 %v2614_v29  ;;  %v2585_v29 = vld [vmem:[#allocation6 + $0x4e8] ss:$16 sps:$4 sm:$0xff]  }
  0xb8   :  { %1409 = vmatmul.mubr.bf16.vlgmr.msra.gmra.mrb[4].mxu1 %v2892_v8  ;;  %v2534_v8 = vld [vmem:[#allocation6 + $0x2c8] ss:$16 sps:$4 sm:$0xff]  }
  0xb9   :  { %1368 = vmatmul.mubr.bf16.vlgmr.msra.gmra.mrb[0].mxu0 %v2902_v15  ;;  %1418 = vmatpush1.bf16.msra.mxu1 %v2516_v16  ;;  %v2570_v16 = vld [vmem:[#allocation6 + $0x448] ss:$16 sps:$4 sm:$0xff]  }
  0xba   :  { %1449 = vmatprep.mubr.bf16.mxu1 %v2888_v52  ;;  %1419 = vmatprep.subr.bf16.mxu1 %v2521_v17  ;;  %v2539_v52 = vld [vmem:[#allocation6 + $0x2ec] ss:$16 sps:$4 sm:$0xff]  }
  0xbb   :  { %1912 = vmatpush1.bf16.msra.mxu0 %v2612_v28  ;;  %v2575_v17 = vld [vmem:[#allocation6 + $0x46c] ss:$16 sps:$4 sm:$0xff]   ;;  %v2657_v28 = vld [vmem:[#allocation8 + $0xf0] ss:$8 sps:$4 sm:$0xff]  }
  0xbc   :  { %1913 = vmatprep.subr.bf16.mxu0 %v2617_v30  ;;  %v2590_v30 = vld [vmem:[#allocation6 + $0x50c] ss:$16 sps:$4 sm:$0xff]  }
  0xbd   :  { %1420 = vmatpush1.bf16.msra.mxu1 %v2519_v18  ;;  %v2648_v18 = vld [vmem:[#allocation8 + $0xc0] ss:$8 sps:$4 sm:$0xff]  }
  0xbe   :  { %1421 = vmatprep.subr.bf16.mxu1 %v2524_v19  ;;  %v2653_v19 = vld [vmem:[#allocation8 + $0xd4] ss:$8 sps:$4 sm:$0xff]  }
  0xbf   :  { %1914 = vmatpush1.bf16.msra.mxu0 %v2615_v32  ;;  %v2662_v32 = vld [vmem:[#allocation8 + $0x104] ss:$8 sps:$4 sm:$0xff]  }
  0xc0   :  { %1915 = vmatprep.subr.bf16.mxu0 %v2620_v34  ;;  %v2591_v34 = vld [vmem:[#allocation6 + $0x528] ss:$16 sps:$4 sm:$0xff]  }
  0xc1   :  { %1422 = vmatpush1.bf16.msra.mxu1 %v2522_v20  ;;  %v2578_v20 = vld [vmem:[#allocation6 + $0x48c] ss:$16 sps:$4 sm:$0xff]  }
  0xc2   :  { %1423 = vmatprep.subr.bf16.mxu1 %v2527_v21  ;;  %v2576_v21 = vld [vmem:[#allocation6 + $0x488] ss:$16 sps:$4 sm:$0xff]  }
  0xc3   :  { %1916 = vmatpush1.bf16.msra.mxu0 %v2618_v37  ;;  %v2594_v37 = vld [vmem:[#allocation6 + $0x548] ss:$16 sps:$4 sm:$0xff]  }
  0xc4   :  { %1917 = vmatprep.subr.bf16.mxu0 %v2623_v39  ;;  %v2597_v39 = vld [vmem:[#allocation6 + $0x568] ss:$16 sps:$4 sm:$0xff]  }
  0xc5   :  { %1424 = vmatpush1.bf16.msra.mxu1 %v2525_v22  ;;  %v2581_v22 = vld [vmem:[#allocation6 + $0x4ac] ss:$16 sps:$4 sm:$0xff]  }
  0xc6   :  { %1425 = vmatprep.subr.bf16.mxu1 %v2530_v23  ;;  %v2579_v23 = vld [vmem:[#allocation6 + $0x4a8] ss:$16 sps:$4 sm:$0xff]  }
  0xc7   :  { %1918 = vmatpush1.bf16.msra.mxu0 %v2621_v41  ;;  %v2600_v41 = vld [vmem:[#allocation6 + $0x588] ss:$16 sps:$4 sm:$0xff]  }
  0xc8   :  { %1919 = vmatprep.subr.bf16.mxu0 %v2626_v43  ;;  %v2603_v43 = vld [vmem:[#allocation6 + $0x5a8] ss:$16 sps:$4 sm:$0xff]  }
  0xc9   :  { %1426 = vmatpush1.bf16.msra.mxu1 %v2528_v24  ;;  %v2584_v24 = vld [vmem:[#allocation6 + $0x4cc] ss:$16 sps:$4 sm:$0xff]  }
  0xca   :  { %1427 = vmatprep.subr.bf16.mxu1 %v2533_v25  ;;  %v2656_v25 = vld [vmem:[#allocation8 + $0xe4] ss:$8 sps:$4 sm:$0xff]  }
  0xcb   :  { %1920 = vmatpush1.bf16.msra.mxu0 %v2624_v45  ;;  %v2606_v45 = vld [vmem:[#allocation6 + $0x5c8] ss:$16 sps:$4 sm:$0xff]  }
  0xcc   :  { %1921 = vmatprep.subr.bf16.mxu0 %v2629_v47  ;;  %v2609_v47 = vld [vmem:[#allocation6 + $0x5e8] ss:$16 sps:$4 sm:$0xff]  }
  0xcd   :  { %1428 = vmatpush1.bf16.msra.mxu1 %v2531_v26  ;;  %v2654_v26 = vld [vmem:[#allocation8 + $0xe0] ss:$8 sps:$4 sm:$0xff]  }
  0xce   :  { %1429 = vmatprep.subr.bf16.mxu1 %v2536_v27  ;;  %v2582_v27 = vld [vmem:[#allocation6 + $0x4c8] ss:$16 sps:$4 sm:$0xff]  }
  0xcf   :  { %1922 = vmatpush1.bf16.msra.mxu0 %v2627_v49 }
  0xd0   :  { %1923 = vmatprep.subr.bf16.mxu0 %v2632_v51 }
  0xd1   :  { %1430 = vmatpush1.bf16.msra.mxu1 %v2534_v8  ;;  %v2587_v8 = vld [vmem:[#allocation6 + $0x4ec] ss:$16 sps:$4 sm:$0xff]  }
  0xd2   :  { %1431 = vmatprep.subr.bf16.mxu1 %v2539_v52  ;;  %v2659_v52 = vld [vmem:[#allocation8 + $0xf4] ss:$8 sps:$4 sm:$0xff]  }
  0xd3   :  { %1924 = vmatpush1.bf16.msra.mxu0 %v2630_v54 }
  0xd4   :  { %1925 = vmatprep.subr.bf16.mxu0 %v2635_v56  ;;  %v2918_v56 = vld [vmem:[%s2958_s2] sm:$0xf] }
  0xd5   :  { %1432 = vmatpush1.bf16.msra.mxu1 %v2537_v31  ;;  %v2588_v31 = vld [vmem:[#allocation6 + $0x508] ss:$16 sps:$4 sm:$0xff]  }
  0xd6   :  { %1433 = vmatprep.subr.bf16.mxu1 %v2542_v33  ;;  %v2593_v33 = vld [vmem:[#allocation6 + $0x52c] ss:$16 sps:$4 sm:$0xff]  }
  0xd7   :  { %1926 = vmatpush1.bf16.msra.mxu0 %v2633_v58 }
  0xd8   :  { %1927 = vmatprep.subr.bf16.mxu0 %v2638_v60 }
  0xd9   :  { %1434 = vmatpush1.bf16.msra.mxu1 %v2540_v36  ;;  %v2596_v36 = vld [vmem:[#allocation6 + $0x54c] ss:$16 sps:$4 sm:$0xff]  }
  0xda   :  { %1435 = vmatprep.subr.bf16.mxu1 %v2545_v38  ;;  %v2599_v38 = vld [vmem:[#allocation6 + $0x56c] ss:$16 sps:$4 sm:$0xff]  }
  0xdb   :  { %1928 = vmatpush1.bf16.msra.mxu0 %v2636_v62 }
  0xdc   :  { %1929 = vmatprep.subr.bf16.mxu0 %v2641_v0 }
  0xdd   :  { %1436 = vmatpush1.bf16.msra.mxu1 %v2543_v40  ;;  %v2602_v40 = vld [vmem:[#allocation6 + $0x58c] ss:$16 sps:$4 sm:$0xff]  }
  0xde   :  { %1437 = vmatprep.subr.bf16.mxu1 %v2548_v42  ;;  %v2605_v42 = vld [vmem:[#allocation6 + $0x5ac] ss:$16 sps:$4 sm:$0xff]  }
  0xdf   :  { %1930 = vmatpush1.bf16.msra.mxu0 %v2639_v2 }
  0xe0   :  { %1931 = vmatprep.subr.bf16.mxu0 %v2644_v4 }
  0xe1   :  { %1438 = vmatpush1.bf16.msra.mxu1 %v2546_v44  ;;  %v2608_v44 = vld [vmem:[#allocation6 + $0x5cc] ss:$16 sps:$4 sm:$0xff]  }
  0xe2   :  { %1439 = vmatprep.subr.bf16.mxu1 %v2551_v46  ;;  %v2611_v46 = vld [vmem:[#allocation6 + $0x5ec] ss:$16 sps:$4 sm:$0xff]  }
  0xe3   :  { %1932 = vmatpush1.bf16.msra.mxu0 %v2642_v7 }
  0xe4   :  { %1933 = vmatprep.subr.bf16.mxu0 %v2647_v9  ;;  %v2660_v9 = vld [vmem:[#allocation8 + $0x100] ss:$8 sps:$4 sm:$0xff]  }
  0xe5   :  { %1440 = vmatpush1.bf16.msra.mxu1 %v2549_v48 }
  0xe6   :  { %1441 = vmatprep.subr.bf16.mxu1 %v2554_v50 }
  0xe7   :  { %1934 = vmatpush1.bf16.msra.mxu0 %v2645_v13  ;;  %v2663_v13 = vld [vmem:[#allocation8 + $0x110] ss:$8 sps:$4 sm:$0xff]  }
  0xe8   :  { %1935 = vmatprep.subr.bf16.mxu0 %v2650_v14  ;;  %v2668_v14 = vld [vmem:[#allocation8 + $0x124] ss:$8 sps:$4 sm:$0xff]  }
  0xe9   :  { %1442 = vmatpush1.bf16.msra.mxu1 %v2552_v53  ;;  %v273_v53 = vlaneseq }
  0xea   :  { %1443 = vmatprep.subr.bf16.mxu1 %v2557_v55 }
  0xeb   :  { %1936 = vmatpush1.bf16.msra.mxu0 %v2648_v18  ;;  %v2910_v54 = vshrl.u32 %v273_v53, 7  ;;  %v2669_v18 = vld [vmem:[#allocation8 + $0x130] ss:$8 sps:$4 sm:$0xff]  }
  0xec   :  { %1937 = vmatprep.subr.bf16.mxu0 %v2653_v19  ;;  %v2674_v19 = vld [vmem:[#allocation8 + $0x144] ss:$8 sps:$4 sm:$0xff]  }
  0xed   :  { %1444 = vmatpush1.bf16.msra.mxu1 %v2555_v57  ;;  %v2913_v55 = vsub.s32 0, %v2910_v54  ;;  %v2921_v57 = vsub.s32 1, %v2910_v54 }
  0xee   :  { %1445 = vmatprep.subr.bf16.mxu1 %v2560_v59 }
  0xef   :  { %v280_v58 = vrot.slane %v2918_v56, %v2921_v57 }
  0xf1   :  { %1446 = vmatpush1.bf16.msra.mxu1 %v2558_v61 }
  0xf2   :  { %1447 = vmatprep.subr.bf16.mxu1 %v2563_v63 }
  0xf5   :  { %1448 = vmatpush1.bf16.msra.mxu1 %v2561_v1 }
  0xf6   :  { %1458 = vmatprep.subr.bf16.mxu1 %v2566_v3 }
  0xf8   :  { %1450 = vmatmul.mubr.bf16.vlgmr.msra.gmra.mrb[4].mxu1 %v2894_v11  ;;  %v2573_v11 = vld [vmem:[#allocation6 + $0x468] ss:$16 sps:$4 sm:$0xff]  }
  0xf9   :  { %1459 = vmatpush1.bf16.msra.mxu1 %v2564_v5  ;;  %1490 = vmatprep.mubr.bf16.mxu1 %v2899_v35  ;;  %v2651_v35 = vld [vmem:[#allocation8 + $0xd0] ss:$8 sps:$4 sm:$0xff]  }
  0xfa   :  { %1460 = vmatprep.subr.bf16.mxu1 %v2569_v6  ;;  %1938 = vmatpush1.bf16.msra.mxu0 %v2651_v35  ;;  %v2675_v35 = vld [vmem:[#allocation8 + $0x150] ss:$8 sps:$4 sm:$0xff]  }
  0xfb   :  { %1939 = vmatprep.subr.bf16.mxu0 %v2656_v25  ;;  %v2686_v25 = vld [vmem:[#allocation8 + $0x184] ss:$8 sps:$4 sm:$0xff]  }
  0xfd   :  { %1461 = vmatpush1.bf16.msra.mxu1 %v2567_v10 }
  0xfe   :  { %1462 = vmatprep.subr.bf16.mxu1 %v2572_v12  ;;  %1940 = vmatpush1.bf16.msra.mxu0 %v2654_v26  ;;  %v2665_v12 = vld [vmem:[#allocation8 + $0x114] ss:$8 sps:$4 sm:$0xff]   ;;  %v2684_v26 = vld [vmem:[#allocation8 + $0x180] ss:$8 sps:$4 sm:$0xff]  }
  0xff   :  { %1941 = vmatprep.subr.bf16.mxu0 %v2659_v52  ;;  %v2692_v52 = vld [vmem:[#allocation8 + $0x1a4] ss:$8 sps:$4 sm:$0xff]  }
 0x101   :  { %1463 = vmatpush1.bf16.msra.mxu1 %v2570_v16  ;;  %v2666_v16 = vld [vmem:[#allocation8 + $0x120] ss:$8 sps:$4 sm:$0xff]  }
 0x102   :  { %1464 = vmatprep.subr.bf16.mxu1 %v2575_v17  ;;  %1942 = vmatpush1.bf16.msra.mxu0 %v2657_v28  ;;  %v2671_v17 = vld [vmem:[#allocation8 + $0x134] ss:$8 sps:$4 sm:$0xff]   ;;  %v2690_v28 = vld [vmem:[#allocation8 + $0x1a0] ss:$8 sps:$4 sm:$0xff]  }
 0x103   :  { %1952 = vmatprep.subr.bf16.mxu0 %v2662_v32  ;;  %v2696_v32 = vld [vmem:[#allocation8 + $0x1c0] ss:$8 sps:$4 sm:$0xff]  }
 0x105   :  { %1465 = vmatpush1.bf16.msra.mxu1 %v2573_v11  ;;  %v2672_v11 = vld [vmem:[#allocation8 + $0x140] ss:$8 sps:$4 sm:$0xff]  }
 0x106   :  { %1466 = vmatprep.subr.bf16.mxu1 %v2578_v20  ;;  %v2677_v20 = vld [vmem:[#allocation8 + $0x154] ss:$8 sps:$4 sm:$0xff]  }
 0x109   :  { %1467 = vmatpush1.bf16.msra.mxu1 %v2576_v21  ;;  %v2680_v21 = vld [vmem:[#allocation8 + $0x164] ss:$8 sps:$4 sm:$0xff]  }
 0x10a   :  { %1468 = vmatprep.subr.bf16.mxu1 %v2581_v22  ;;  %v2678_v22 = vld [vmem:[#allocation8 + $0x160] ss:$8 sps:$4 sm:$0xff]  }
 0x10d   :  { %1469 = vmatpush1.bf16.msra.mxu1 %v2579_v23  ;;  %v2683_v23 = vld [vmem:[#allocation8 + $0x174] ss:$8 sps:$4 sm:$0xff]  }
 0x10e   :  { %1470 = vmatprep.subr.bf16.mxu1 %v2584_v24  ;;  %v2681_v24 = vld [vmem:[#allocation8 + $0x170] ss:$8 sps:$4 sm:$0xff]  }
 0x111   :  { %1471 = vmatpush1.bf16.msra.mxu1 %v2582_v27  ;;  %v2689_v27 = vld [vmem:[#allocation8 + $0x194] ss:$8 sps:$4 sm:$0xff]  }
 0x112   :  { %1472 = vmatprep.subr.bf16.mxu1 %v2587_v8  ;;  %v2687_v8 = vld [vmem:[#allocation8 + $0x190] ss:$8 sps:$4 sm:$0xff]  }
 0x115   :  { %1473 = vmatpush1.bf16.msra.mxu1 %v2585_v29  ;;  %v2695_v29 = vld [vmem:[#allocation8 + $0x1b4] ss:$8 sps:$4 sm:$0xff]  }
 0x116   :  { %1474 = vmatprep.subr.bf16.mxu1 %v2590_v30  ;;  %v2693_v30 = vld [vmem:[#allocation8 + $0x1b0] ss:$8 sps:$4 sm:$0xff]  }
 0x119   :  { %1475 = vmatpush1.bf16.msra.mxu1 %v2588_v31  ;;  %v2698_v31 = vld [vmem:[#allocation8 + $0x1c4] ss:$8 sps:$4 sm:$0xff]  }
 0x11a   :  { %1476 = vmatprep.subr.bf16.mxu1 %v2593_v33  ;;  %v2701_v33 = vld [vmem:[#allocation8 + $0x1d4] ss:$8 sps:$4 sm:$0xff]  }
 0x11d   :  { %1477 = vmatpush1.bf16.msra.mxu1 %v2591_v34  ;;  %v2699_v34 = vld [vmem:[#allocation8 + $0x1d0] ss:$8 sps:$4 sm:$0xff]  }
 0x11e   :  { %1478 = vmatprep.subr.bf16.mxu1 %v2596_v36  ;;  %v2704_v36 = vld [vmem:[#allocation8 + $0x1e4] ss:$8 sps:$4 sm:$0xff]  }
 0x121   :  { %1479 = vmatpush1.bf16.msra.mxu1 %v2594_v37  ;;  %v2702_v37 = vld [vmem:[#allocation8 + $0x1e0] ss:$8 sps:$4 sm:$0xff]  }
 0x122   :  { %1480 = vmatprep.subr.bf16.mxu1 %v2599_v38  ;;  %v2707_v38 = vld [vmem:[#allocation8 + $0x1f4] ss:$8 sps:$4 sm:$0xff]  }
 0x125   :  { %1481 = vmatpush1.bf16.msra.mxu1 %v2597_v39  ;;  %v2705_v39 = vld [vmem:[#allocation8 + $0x1f0] ss:$8 sps:$4 sm:$0xff]  }
 0x126   :  { %1482 = vmatprep.subr.bf16.mxu1 %v2602_v40  ;;  %v283_v40 = vsub.s32 2, %v2910_v54 }
 0x129   :  { %1483 = vmatpush1.bf16.msra.mxu1 %v2600_v41  ;;  %v287_v41 = vsub.s32 3, %v2910_v54  ;;  %v1579_v54 = vld [vmem:[%s2960_s4] sm:$0x3] }
 0x12a   :  { %1484 = vmatprep.subr.bf16.mxu1 %v2605_v42  ;;  %v284_v42 = vrot.slane %v2918_v56, %v283_v40 }
 0x12d   :  { %1485 = vmatpush1.bf16.msra.mxu1 %v2603_v43  ;;  %v288_v43 = vrot.slane %v2918_v56, %v287_v41 }
 0x12e   :  { %1486 = vmatprep.subr.bf16.mxu1 %v2608_v44 }
 0x131   :  { %1487 = vmatpush1.bf16.msra.mxu1 %v2606_v45 }
 0x132   :  { %1488 = vmatprep.subr.bf16.mxu1 %v2611_v46 }
 0x135   :  { %1489 = vmatpush1.bf16.msra.mxu1 %v2609_v47 }
 0x138   :  { %1491 = vmatmul.mubr.bf16.vlgmr.msra.gmra.mrb[4].mxu1 %v2902_v15  ;;  %v276_v15 = vrot.slane %v2918_v56, %v2913_v55  ;;  %v1584_v56 = vrot.slane %v1579_v54, %v2913_v55 }
 0x14b   :  { %v1287_v48 = vpop.f32.mrb[0].mxu1 }
 0x14c   :  { %v1289_v49 = vpop.f32.mrb[1].mxu1  ;;  %v1288_v59 = vadd.f32 %v1287_v48, %v276_v15 }
 0x14d   :  { %v1291_v50 = vpop.f32.mrb[2].mxu1  ;;  %v1290_v60 = vadd.f32 %v1289_v49, %v280_v58 }
 0x14e   :  { %v1292_v51 = vpop.f32.mrb[3].mxu1 }
 0x18c   :  { %v1369_v61 = vpop.f32.mrb[0].mxu0 }
 0x18d   :  { %v2293_v62 = vadd.f32 %v1369_v61, %v1288_v59  ;;  %v1371_v63 = vpop.f32.mrb[1].mxu0  ;;  %v1999_v61 = vld [vmem:[%s2961_s5] sm:$0x3] }
 0x18e   :  { %v2295_v0 = vadd.f32 %v1371_v63, %v1290_v60  ;;  %v1373_v1 = vpop.f32.mrb[2].mxu0  ;;  %v1588_v60 = vrot.slane %v1579_v54, %v2921_v57 }
 0x18f   :  { %vm1499_vm0 = vcmp.gt.f32.partialorder %v2293_v62, 0.0  ;;  %v1503_v2 = vmul.f32 0.2, %v2293_v62  ;;  %v1374_v3 = vpop.f32.mrb[3].mxu0 }
 0x190   :  { %vm1500_vm1 = vcmp.gt.f32.partialorder %v2295_v0, 0.0  ;;  %v1504_v4 = vmul.f32 0.2, %v2295_v0  ;;  %v2004_v3 = vrot.slane %v1999_v61, %v2913_v55 }
 0x191   :  { %v1507_v5 = vsel %vm1499_vm0, %v2293_v62, %v1503_v2 }
 0x192   :  { %v1508_v6 = vsel %vm1500_vm1, %v2295_v0, %v1504_v4  ;;  %v1511_v10 = vpack.c.bf16 %v1507_v5, %v1507_v5 }
 0x193   :  { %v1512_v7 = vpack.c.bf16 %v1508_v6, %v1508_v6  ;;  %v2008_v6 = vrot.slane %v1999_v61, %v2921_v57 }
 0x195   :  { %1943 = vmatprep.mubr.bf16.mxu0 %v1512_v7 }
 0x196   :  { %1944 = vmatmul.mubr.bf16.vlgmr.msra.gmra.mrb[4].mxu0 %v1511_v10 }
 0x197   :  { %1953 = vmatpush1.bf16.msra.mxu0 %v2660_v9 }
 0x198   :  { %1954 = vmatprep.subr.bf16.mxu0 %v2665_v12 }
 0x19b   :  { %1955 = vmatpush1.bf16.msra.mxu0 %v2663_v13 }
 0x19c   :  { %1956 = vmatprep.subr.bf16.mxu0 %v2668_v14 }
 0x19f   :  { %1957 = vmatpush1.bf16.msra.mxu0 %v2666_v16  ;;  %v2017_v16 = vstv %s2962_s6 }
 0x1a0   :  { %1958 = vmatprep.subr.bf16.mxu0 %v2671_v17 }
 0x1a3   :  { %1959 = vmatpush1.bf16.msra.mxu0 %v2669_v18 }
 0x1a4   :  { %1960 = vmatprep.subr.bf16.mxu0 %v2674_v19 }
 0x1a7   :  { %1961 = vmatpush1.bf16.msra.mxu0 %v2672_v11 }
 0x1a8   :  { %1962 = vmatprep.subr.bf16.mxu0 %v2677_v20 }
 0x1ab   :  { %1963 = vmatpush1.bf16.msra.mxu0 %v2675_v35 }
 0x1ac   :  { %1964 = vmatprep.subr.bf16.mxu0 %v2680_v21 }
 0x1af   :  { %1965 = vmatpush1.bf16.msra.mxu0 %v2678_v22 }
 0x1b0   :  { %1966 = vmatprep.subr.bf16.mxu0 %v2683_v23 }
 0x1b3   :  { %1967 = vmatpush1.bf16.msra.mxu0 %v2681_v24 }
 0x1b4   :  { %1968 = vmatprep.subr.bf16.mxu0 %v2686_v25 }
 0x1b7   :  { %1969 = vmatpush1.bf16.msra.mxu0 %v2684_v26 }
 0x1b8   :  { %1970 = vmatprep.subr.bf16.mxu0 %v2689_v27 }
 0x1bb   :  { %1971 = vmatpush1.bf16.msra.mxu0 %v2687_v8 }
 0x1bc   :  { %1972 = vmatprep.subr.bf16.mxu0 %v2692_v52 }
 0x1bf   :  { %1973 = vmatpush1.bf16.msra.mxu0 %v2690_v28 }
 0x1c0   :  { %1974 = vmatprep.subr.bf16.mxu0 %v2695_v29 }
 0x1c3   :  { %1975 = vmatpush1.bf16.msra.mxu0 %v2693_v30 }
 0x1c4   :  { %1976 = vmatprep.subr.bf16.mxu0 %v2698_v31 }
 0x1c7   :  { %1977 = vmatpush1.bf16.msra.mxu0 %v2696_v32 }
 0x1c8   :  { %1978 = vmatprep.subr.bf16.mxu0 %v2701_v33 }
 0x1cb   :  { %1979 = vmatpush1.bf16.msra.mxu0 %v2699_v34 }
 0x1cc   :  { %1980 = vmatprep.subr.bf16.mxu0 %v2704_v36 }
 0x1cf   :  { %1981 = vmatpush1.bf16.msra.mxu0 %v2702_v37 }
 0x1d0   :  { %1982 = vmatprep.subr.bf16.mxu0 %v2707_v38 }
 0x1d3   :  { %1983 = vmatpush1.bf16.msra.mxu0 %v2705_v39 }
 0x20b   :  { %v1492_v44 = vpop.f32.mrb[4].mxu1 }
 0x20c   :  { %v2296_v45 = vadd.f32 %v1492_v44, %v284_v42  ;;  %v1494_v46 = vpop.f32.mrb[5].mxu1 }
 0x20d   :  { %v2297_v47 = vadd.f32 %v1494_v46, %v288_v43  ;;  %v1496_v48 = vpop.f32.mrb[6].mxu1 }
 0x20e   :  { %vm1501_vm2 = vcmp.gt.f32.partialorder %v2296_v45, 0.0  ;;  %v1505_v49 = vmul.f32 0.2, %v2296_v45  ;;  %v1497_v50 = vpop.f32.mrb[7].mxu1 }
 0x20f   :  { %vm1502_vm3 = vcmp.gt.f32.partialorder %v2297_v47, 0.0  ;;  %v1506_v51 = vmul.f32 0.2, %v2297_v47 }
 0x210   :  { %v1509_v53 = vsel %vm1501_vm2, %v2296_v45, %v1505_v49 }
 0x211   :  { %v1510_v15 = vsel %vm1502_vm3, %v2297_v47, %v1506_v51  ;;  %v1513_v59 = vpack.c.bf16 %v1509_v53, %v1509_v53 }
 0x212   :  { %v1514_v58 = vpack.c.bf16 %v1510_v15, %v1510_v15 }
 0x214   :  { %1984 = vmatprep.mubr.bf16.mxu0 %v1514_v58 }
 0x215   :  { %1985 = vmatmul.mubr.bf16.vlgmr.msra.gmra.mrb[4].mxu0 %v1513_v59 }
 0x2e8   :  { %v1986_v62 = vpop.f32.mrb[4].mxu0 }
 0x2e9   :  { %v2298_v63 = vadd.f32 %v1986_v62, %v1584_v56  ;;  %v1988_v0 = vpop.f32.mrb[5].mxu0 }
 0x2ea   :  { %v2299_v1 = vadd.f32 %v1988_v0, %v1588_v60  ;;  %v1990_v2 = vpop.f32.mrb[6].mxu0 }
 0x2eb   :  { %vm1993_vm4 = vcmp.gt.f32.partialorder %v2298_v63, 0.0  ;;  %v1995_v4 = vmul.f32 0.2, %v2298_v63  ;;  %v1991_v5 = vpop.f32.mrb[7].mxu0 }
 0x2ec   :  { %vm1994_vm5 = vcmp.gt.f32.partialorder %v2299_v1, 0.0  ;;  %v1996_v7 = vmul.f32 0.2, %v2299_v1 }
 0x2ed   :  { %v1997_v9 = vsel %vm1993_vm4, %v2298_v63, %v1995_v4 }
 0x2ee   :  { %v1998_v10 = vsel %vm1994_vm5, %v2299_v1, %v1996_v7  ;;  %v2011_v12 = vmul.f32 %v2004_v3, %v1997_v9 }
 0x2ef   :  { %v2012_v13 = vmul.f32 %v2008_v6, %v1998_v10 }
 0x2f1   :  { %v2013_v14 = vadd.f32 %v2012_v13, %v2011_v12 }
 0x2f3   :  { %2014 = vadd.xlane.f32.xlu0 %v2013_v14 }
 0x380   :  { %v2015_v55 = vpop.xlane.xlu0 %2014 }
 0x381   :  { %v2018_v17 = vadd.f32 %v2017_v16, %v2015_v55 }
 0x383   :  { %2019 = vst [vmem:[#allocation9] sm:$0xff] %v2018_v17 }
 0x384   :  { %2785 = shalt.err (!%p2782_p0)
}
 0x385   :  { %s2786_s26 = scalar_lea.hbm %s2963_s7, 128 }
 0x386   :  { %p2787_p1 = scmp.ne.s32.totalorder %s2963_s7, %s2786_s26  ;;  %p2790_p2 = scmp.lt.u32.totalorder %s2786_s26, %s2963_s7 }
 0x388   :  { %p2792_p3 = pnand %p2790_p2, %p2787_p1 }
 0x38a   :  { %2795 = shalt.err (!%p2792_p3)
}
 0x38b   :  { %2029 = dma.vmem_to_hbm [thread:$0]  %s2027_s21, 128, %s2963_s7, [#allocation5]  }
 0x38c   :  { %2800 = dma.done.wait [#allocation5], 128  }
 0x38d   :  { %2801 = vsyncadd [#allocation5], 4294967168 }
 0x38e   :  { %2033 = vsyncpa [#allocation4], 1 }
 0x38f   :  { %2034 = vsyncpa [#allocation7], 1 }
 0x390   :  { %2035 = vsyncpa [#allocation5], 1 }

</bundles_post_ra>
